<compile_context>
chip_gen: v7x
topology: tpu7x:2x2x1
jax: 0.10.0
libtpu: 0.0.40
codegen_flags: <defaults>
</compile_context>

<pallas_src>
import jax
import jax.numpy as jnp
from jax.experimental import pallas as pl
from jax.experimental.pallas import tpu as pltpu

LANE = 128


def _round_up(n, m):
    return ((n + m - 1) // m) * m


# ----------------------------------------------------------------------------
# Pallas kernel: one (bm, *) batch tile of the 3-layer MLP hot path
# ----------------------------------------------------------------------------
def _d4pg_critic_kernel(x_ref, a_ref,
                        w1_ref, b1_ref,
                        w2o_ref, w2a_ref, b2_ref,
                        w3_ref, b3_ref,
                        out_ref):
    bf16 = jnp.bfloat16

    # obs = ReLU(x @ W1 + b1)                                    (bm, 512)
    h1 = jnp.dot(x_ref[...].astype(bf16), w1_ref[...],
                 preferred_element_type=jnp.float32)
    h1 = jnp.maximum(h1 + b1_ref[...].astype(jnp.float32), 0.0)

    # hidden = ReLU(obs @ W2_obs + a @ W2_act + b2)              (bm, 384)
    # concat([obs, a]) @ W2 is split into two dots; the tiny K=act dot is
    # computed just before the epilogue so its result isn't live across the
    # big matmuls.
    h2 = jnp.dot(h1.astype(bf16), w2o_ref[...],
                 preferred_element_type=jnp.float32)
    h2a = jnp.dot(a_ref[...].astype(bf16), w2a_ref[...],
                  preferred_element_type=jnp.float32)
    h2 = jnp.maximum(h2 + h2a + b2_ref[...].astype(jnp.float32), 0.0)

    # logits = hidden @ W3 + b3 ; store only the real n_atoms columns
    out = jnp.dot(h2.astype(bf16), w3_ref[...],
                  preferred_element_type=jnp.float32)
    out = out + b3_ref[...].astype(jnp.float32)
    out_ref[...] = out[:, : out_ref.shape[-1]].astype(out_ref.dtype)


def _choose_block_b(batch):
    # Aim for >=2 grid steps (both v7x TensorCores busy) while capping the
    # tile at 512 rows: big enough to amortize per-grid-step overhead, small
    # enough for v5e's 16 MiB default scoped VMEM.
    half = _round_up(max(pl.cdiv(batch, 2), 1), 8)
    return max(8, min(512, half))


# ----------------------------------------------------------------------------
# Wrapper: grid over batch rows (ragged last block), weights resident in VMEM
# ----------------------------------------------------------------------------
def d4pg_critic_forward(x, a, params, n_atoms, *, block_b=None):
    """D4PGCritic forward pass -> (B, n_atoms) f32 logits.

    block_b: rows per grid step (multiple of 8).  Default picks a tile that
    amortizes per-step pipeline overhead and still yields >=2 grid steps for
    megacore parallelism when B is large enough.
    """
    w1, b1, w2o, w2a, b2, w3, b3 = params
    B = x.shape[0]
    obs_size = x.shape[1]
    act_size = a.shape[1]
    h1_p = w1.shape[1]          # 512
    h2_p = w2o.shape[1]         # 384
    out_p = w3.shape[1]         # 128

    bm = _choose_block_b(B) if block_b is None else _round_up(int(block_b), 8)
    grid = (pl.cdiv(B, bm),)

    def row_spec(shape):
        return pl.BlockSpec(shape, lambda i: (i, 0))

    def resident_spec(shape):
        return pl.BlockSpec(shape, lambda i: (0, 0))

    flops = 2 * B * (obs_size * h1_p + h1_p * h2_p + act_size * h2_p
                     + h2_p * out_p)
    weight_bytes = sum(int(p.size) * p.dtype.itemsize for p in params)
    bytes_accessed = int(weight_bytes
                         + x.size * x.dtype.itemsize
                         + a.size * a.dtype.itemsize
                         + B * n_atoms * 4)
    cost = pl.CostEstimate(flops=int(flops), transcendentals=0,
                           bytes_accessed=bytes_accessed)

    if bm >= 1024:
        # v5e's default scoped-VMEM limit (16 MiB) is the only tier that can
        # trip at very large tiles; raise it explicitly in that case.
        compiler_params = pltpu.CompilerParams(
            dimension_semantics=("parallel",),
            vmem_limit_bytes=64 * 1024 * 1024)
    else:
        compiler_params = pltpu.CompilerParams(
            dimension_semantics=("parallel",))

    return pl.pallas_call(
        _d4pg_critic_kernel,
        out_shape=jax.ShapeDtypeStruct((B, n_atoms), jnp.float32),
        grid=grid,
        in_specs=[
            row_spec((bm, obs_size)),       # x tile (un-padded features)
            row_spec((bm, act_size)),       # a tile (un-padded features)
            resident_spec(w1.shape), resident_spec(b1.shape),
            resident_spec(w2o.shape), resident_spec(w2a.shape),
            resident_spec(b2.shape),
            resident_spec(w3.shape), resident_spec(b3.shape),
        ],
        out_specs=row_spec((bm, n_atoms)),  # sliced in-kernel, no post-pass
        compiler_params=compiler_params,
        cost_estimate=cost,
    )(x, a, w1, b1, w2o, w2a, b2, w3, b3)


# ----------------------------------------------------------------------------
# Parameter init (PyTorch-style uniform(-1/sqrt(fan_in), +)).
# Only the hidden / output N dims are zero-padded to lane multiples; the K
# rows of W1 / W2_act keep the true obs_size / act_size.
# ----------------------------------------------------------------------------
def init_params(key, obs_size, act_size, n_atoms, hidden1=400, hidden2=300):
    def linear(key, fan_in, fan_out):
        kw, kb = jax.random.split(key)
        bound = 1.0 / jnp.sqrt(jnp.float32(fan_in))
        w = jax.random.uniform(kw, (fan_in, fan_out), jnp.float32, -bound, bound)
        b = jax.random.uniform(kb, (1, fan_out), jnp.float32, -bound, bound)
        return w, b

    k1, k2, k3 = jax.random.split(key, 3)
    w1, b1 = linear(k1, obs_size, hidden1)               # Linear(obs_size, 400)
    w2, b2 = linear(k2, hidden1 + act_size, hidden2)     # Linear(400+act, 300)
    w3, b3 = linear(k3, hidden2, n_atoms)                # Linear(300, n_atoms)
    w2o, w2a = w2[:hidden1, :], w2[hidden1:, :]          # concat -> sum of dots

    h1_p = _round_up(hidden1, LANE)     # 512
    h2_p = _round_up(hidden2, LANE)     # 384
    out_p = _round_up(n_atoms, LANE)    # 128

    def pad2(m, rows, cols):
        return jnp.zeros((rows, cols), m.dtype).at[:m.shape[0], :m.shape[1]].set(m)

    bf16 = jnp.bfloat16
    return (
        pad2(w1, obs_size, h1_p).astype(bf16),   # (obs, 512)
        pad2(b1, 1, h1_p).astype(bf16),          # (1, 512)  padded lanes zero
        pad2(w2o, h1_p, h2_p).astype(bf16),      # (512, 384) padded K rows zero
        pad2(w2a, act_size, h2_p).astype(bf16),  # (act, 384)
        pad2(b2, 1, h2_p).astype(bf16),          # (1, 384)
        pad2(w3, h2_p, out_p).astype(bf16),      # (384, 128) padded K rows zero
        pad2(b3, 1, out_p).astype(bf16),         # (1, 128)
    )


# Pure-JAX reference matching the kernel's bf16-operand / f32-accumulate math.
def reference_forward(x, a, params, n_atoms):
    w1, b1, w2o, w2a, b2, w3, b3 = params
    f32 = jnp.float32
    hp = jax.lax.Precision.HIGHEST
    xf = x.astype(jnp.bfloat16).astype(f32)
    af = a.astype(jnp.bfloat16).astype(f32)

    h1 = jnp.dot(xf, w1.astype(f32), precision=hp) + b1.astype(f32)
    h1 = jnp.maximum(h1, 0.0).astype(jnp.bfloat16).astype(f32)

    h2 = (jnp.dot(h1, w2o.astype(f32), precision=hp)
          + jnp.dot(af, w2a.astype(f32), precision=hp)
          + b2.astype(f32))
    h2 = jnp.maximum(h2, 0.0).astype(jnp.bfloat16).astype(f32)

    out = jnp.dot(h2, w3.astype(f32), precision=hp) + b3.astype(f32)
    return out[:, :n_atoms]


if __name__ == "__main__":
    # Small, module-consistent shapes.
    B = 2
    obs_size = 32
    act_size = 8
    n_atoms = 51
    v_min, v_max = -10.0, 10.0
    # TODO(synk): the `supports` buffer and distr_to_q (softmax expectation)
    # are not part of forward(); they stay in plain JAX if needed.

    key = jax.random.PRNGKey(0)
    kx, ka, kp = jax.random.split(key, 3)
    x = jax.random.normal(kx, (B, obs_size), jnp.float32)
    a = jax.random.normal(ka, (B, act_size), jnp.float32)
    params = init_params(kp, obs_size, act_size, n_atoms)

    out = d4pg_critic_forward(x, a, params, n_atoms)
    out = jax.block_until_ready(out)
    ref = reference_forward(x, a, params, n_atoms)
    assert out.shape == (B, n_atoms), out.shape
    assert jnp.allclose(out, ref, atol=2e-3, rtol=2e-3), "mismatch vs reference (B=2)"

    # Larger, non-multiple batch exercises the multi-step grid + ragged block.
    B2 = 300
    x2 = jax.random.normal(jax.random.PRNGKey(1), (B2, obs_size), jnp.float32)
    a2 = jax.random.normal(jax.random.PRNGKey(2), (B2, act_size), jnp.float32)
    out2 = jax.block_until_ready(d4pg_critic_forward(x2, a2, params, n_atoms))
    ref2 = reference_forward(x2, a2, params, n_atoms)
    assert out2.shape == (B2, n_atoms), out2.shape
    assert jnp.allclose(out2, ref2, atol=2e-3, rtol=2e-3), "mismatch vs reference (B=300)"

    print("KERNEL_OK")
</pallas_src>

<mosaic_0001>
module attributes {stable_mosaic.version = 11 : i64} {
  func.func @_d4pg_critic_kernel(%arg0: i32, %arg1: memref<8x32xf32, #tpu.memory_space<vmem>>, %arg2: memref<8x8xf32, #tpu.memory_space<vmem>>, %arg3: memref<32x512xbf16, #tpu.memory_space<vmem>>, %arg4: memref<1x512xbf16, #tpu.memory_space<vmem>>, %arg5: memref<512x384xbf16, #tpu.memory_space<vmem>>, %arg6: memref<8x384xbf16, #tpu.memory_space<vmem>>, %arg7: memref<1x384xbf16, #tpu.memory_space<vmem>>, %arg8: memref<384x128xbf16, #tpu.memory_space<vmem>>, %arg9: memref<1x128xbf16, #tpu.memory_space<vmem>>, %arg10: memref<8x51xf32, #tpu.memory_space<vmem>>) attributes {dimension_semantics = [#tpu.dimension_semantics<parallel>], iteration_bounds = array<i64: 1>, scalar_prefetch = 0 : i64, scratch_operands = 0 : i64, tpu.core_type = #tpu.core_type<tc>, window_params = [{transform_indices = @transform_0, window_bounds = array<i64: 8, 32>}, {transform_indices = @transform_1, window_bounds = array<i64: 8, 8>}, {pipeline_mode = #tpu.pipeline_mode<synchronous>, transform_indices = @transform_2, window_bounds = array<i64: 32, 512>}, {pipeline_mode = #tpu.pipeline_mode<synchronous>, transform_indices = @transform_3, window_bounds = array<i64: 1, 512>}, {pipeline_mode = #tpu.pipeline_mode<synchronous>, transform_indices = @transform_4, window_bounds = array<i64: 512, 384>}, {pipeline_mode = #tpu.pipeline_mode<synchronous>, transform_indices = @transform_5, window_bounds = array<i64: 8, 384>}, {pipeline_mode = #tpu.pipeline_mode<synchronous>, transform_indices = @transform_6, window_bounds = array<i64: 1, 384>}, {pipeline_mode = #tpu.pipeline_mode<synchronous>, transform_indices = @transform_7, window_bounds = array<i64: 384, 128>}, {pipeline_mode = #tpu.pipeline_mode<synchronous>, transform_indices = @transform_8, window_bounds = array<i64: 1, 128>}, {transform_indices = @transform_9, window_bounds = array<i64: 8, 51>}]} {
    %c0 = arith.constant 0 : index
    %c0_0 = arith.constant 0 : index
    %0 = vector.load %arg1[%c0, %c0_0] : memref<8x32xf32, #tpu.memory_space<vmem>>, vector<8x32xf32>
    %1 = arith.truncf %0 : vector<8x32xf32> to vector<8x32xbf16>
    %c0_1 = arith.constant 0 : index
    %c0_2 = arith.constant 0 : index
    %2 = vector.load %arg3[%c0_1, %c0_2] : memref<32x512xbf16, #tpu.memory_space<vmem>>, vector<32x512xbf16>
    %cst = arith.constant dense<0.000000e+00> : vector<8x512xf32>
    %3 = tpu.matmul %1, %2, %cst {dimension_numbers = #tpu.dot_dimension_numbers<[1], [0], [0], [1], [0, 0, 1, 1], [], []>} : vector<8x32xbf16>, vector<32x512xbf16>, vector<8x512xf32> -> vector<8x512xf32>
    %c0_3 = arith.constant 0 : index
    %c0_4 = arith.constant 0 : index
    %4 = vector.load %arg4[%c0_3, %c0_4] : memref<1x512xbf16, #tpu.memory_space<vmem>>, vector<1x512xbf16>
    %5 = arith.extf %4 : vector<1x512xbf16> to vector<1x512xf32>
    %6 = vector.broadcast %5 : vector<1x512xf32> to vector<8x512xf32>
    %7 = arith.addf %3, %6 : vector<8x512xf32>
    %cst_5 = arith.constant 0.000000e+00 : f32
    %8 = vector.broadcast %cst_5 : f32 to vector<8x512xf32>
    %9 = arith.maximumf %7, %8 : vector<8x512xf32>
    %10 = arith.truncf %9 : vector<8x512xf32> to vector<8x512xbf16>
    %c0_6 = arith.constant 0 : index
    %c0_7 = arith.constant 0 : index
    %11 = vector.load %arg5[%c0_6, %c0_7] : memref<512x384xbf16, #tpu.memory_space<vmem>>, vector<512x384xbf16>
    %cst_8 = arith.constant dense<0.000000e+00> : vector<8x384xf32>
    %12 = tpu.matmul %10, %11, %cst_8 {dimension_numbers = #tpu.dot_dimension_numbers<[1], [0], [0], [1], [0, 0, 1, 1], [], []>} : vector<8x512xbf16>, vector<512x384xbf16>, vector<8x384xf32> -> vector<8x384xf32>
    %c0_9 = arith.constant 0 : index
    %c0_10 = arith.constant 0 : index
    %13 = vector.load %arg2[%c0_9, %c0_10] : memref<8x8xf32, #tpu.memory_space<vmem>>, vector<8x8xf32>
    %14 = arith.truncf %13 : vector<8x8xf32> to vector<8x8xbf16>
    %c0_11 = arith.constant 0 : index
    %c0_12 = arith.constant 0 : index
    %15 = vector.load %arg6[%c0_11, %c0_12] : memref<8x384xbf16, #tpu.memory_space<vmem>>, vector<8x384xbf16>
    %cst_13 = arith.constant dense<0.000000e+00> : vector<8x384xf32>
    %16 = tpu.matmul %14, %15, %cst_13 {dimension_numbers = #tpu.dot_dimension_numbers<[1], [0], [0], [1], [0, 0, 1, 1], [], []>} : vector<8x8xbf16>, vector<8x384xbf16>, vector<8x384xf32> -> vector<8x384xf32>
    %17 = arith.addf %12, %16 : vector<8x384xf32>
    %c0_14 = arith.constant 0 : index
    %c0_15 = arith.constant 0 : index
    %18 = vector.load %arg7[%c0_14, %c0_15] : memref<1x384xbf16, #tpu.memory_space<vmem>>, vector<1x384xbf16>
    %19 = arith.extf %18 : vector<1x384xbf16> to vector<1x384xf32>
    %20 = vector.broadcast %19 : vector<1x384xf32> to vector<8x384xf32>
    %21 = arith.addf %17, %20 : vector<8x384xf32>
    %cst_16 = arith.constant 0.000000e+00 : f32
    %22 = vector.broadcast %cst_16 : f32 to vector<8x384xf32>
    %23 = arith.maximumf %21, %22 : vector<8x384xf32>
    %24 = arith.truncf %23 : vector<8x384xf32> to vector<8x384xbf16>
    %c0_17 = arith.constant 0 : index
    %c0_18 = arith.constant 0 : index
    %25 = vector.load %arg8[%c0_17, %c0_18] : memref<384x128xbf16, #tpu.memory_space<vmem>>, vector<384x128xbf16>
    %cst_19 = arith.constant dense<0.000000e+00> : vector<8x128xf32>
    %26 = tpu.matmul %24, %25, %cst_19 {dimension_numbers = #tpu.dot_dimension_numbers<[1], [0], [0], [1], [0, 0, 1, 1], [], []>} : vector<8x384xbf16>, vector<384x128xbf16>, vector<8x128xf32> -> vector<8x128xf32>
    %c0_20 = arith.constant 0 : index
    %c0_21 = arith.constant 0 : index
    %27 = vector.load %arg9[%c0_20, %c0_21] : memref<1x128xbf16, #tpu.memory_space<vmem>>, vector<1x128xbf16>
    %28 = arith.extf %27 : vector<1x128xbf16> to vector<1x128xf32>
    %29 = vector.broadcast %28 : vector<1x128xf32> to vector<8x128xf32>
    %30 = arith.addf %26, %29 : vector<8x128xf32>
    %31 = vector.extract_strided_slice %30 {offsets = [0, 0], sizes = [8, 51], strides = [1, 1]} : vector<8x128xf32> to vector<8x51xf32>
    %c0_22 = arith.constant 0 : index
    %c0_23 = arith.constant 0 : index
    %32 = vector.load %arg10[%c0_22, %c0_23] : memref<8x51xf32, #tpu.memory_space<vmem>>, vector<8x51xf32>
    tpu.vector_store %arg10[%c0_22, %c0_23], %31 {strides = array<i32>} : memref<8x51xf32, #tpu.memory_space<vmem>>, vector<8x51xf32>,
    return
  }
  func.func @transform_0(%arg0: i32) -> (i32, i32) {
    %c0_i32 = arith.constant 0 : i32
    %c0_i32_0 = arith.constant 0 : i32
    return %arg0, %c0_i32 : i32, i32
  }
  func.func @transform_1(%arg0: i32) -> (i32, i32) {
    %c0_i32 = arith.constant 0 : i32
    %c0_i32_0 = arith.constant 0 : i32
    return %arg0, %c0_i32 : i32, i32
  }
  func.func @transform_2(%arg0: i32) -> (i32, i32) {
    %c0_i32 = arith.constant 0 : i32
    %c0_i32_0 = arith.constant 0 : i32
    %c0_i32_1 = arith.constant 0 : i32
    return %c0_i32, %c0_i32_0 : i32, i32
  }
  func.func @transform_3(%arg0: i32) -> (i32, i32) {
    %c0_i32 = arith.constant 0 : i32
    %c0_i32_0 = arith.constant 0 : i32
    %c0_i32_1 = arith.constant 0 : i32
    return %c0_i32, %c0_i32_0 : i32, i32
  }
  func.func @transform_4(%arg0: i32) -> (i32, i32) {
    %c0_i32 = arith.constant 0 : i32
    %c0_i32_0 = arith.constant 0 : i32
    %c0_i32_1 = arith.constant 0 : i32
    return %c0_i32, %c0_i32_0 : i32, i32
  }
  func.func @transform_5(%arg0: i32) -> (i32, i32) {
    %c0_i32 = arith.constant 0 : i32
    %c0_i32_0 = arith.constant 0 : i32
    %c0_i32_1 = arith.constant 0 : i32
    return %c0_i32, %c0_i32_0 : i32, i32
  }
  func.func @transform_6(%arg0: i32) -> (i32, i32) {
    %c0_i32 = arith.constant 0 : i32
    %c0_i32_0 = arith.constant 0 : i32
    %c0_i32_1 = arith.constant 0 : i32
    return %c0_i32, %c0_i32_0 : i32, i32
  }
  func.func @transform_7(%arg0: i32) -> (i32, i32) {
    %c0_i32 = arith.constant 0 : i32
    %c0_i32_0 = arith.constant 0 : i32
    %c0_i32_1 = arith.constant 0 : i32
    return %c0_i32, %c0_i32_0 : i32, i32
  }
  func.func @transform_8(%arg0: i32) -> (i32, i32) {
    %c0_i32 = arith.constant 0 : i32
    %c0_i32_0 = arith.constant 0 : i32
    %c0_i32_1 = arith.constant 0 : i32
    return %c0_i32, %c0_i32_0 : i32, i32
  }
  func.func @transform_9(%arg0: i32) -> (i32, i32) {
    %c0_i32 = arith.constant 0 : i32
    %c0_i32_0 = arith.constant 0 : i32
    return %arg0, %c0_i32 : i32, i32
  }
}

</mosaic_0001>

<bundles_post_ra>
// kernel: tpu_custom_call.1
= control target key start
LH: loop header
LB: loop body
LE: loop exit
PB: predicated region body
PF: predicated region fallthrough
CT: control target
= control target key end

     0   :  { %14 = vsyncpa [#allocation3], 0  ;;  %s2265_s0 = inlined_call_operand.hbm [shape: f32[2,32], index: 0, kind: input, shape index: {}]   ;;  %s2266_s1 = inlined_call_operand.vmem [shape: f32[2,8], index: 1, kind: input, shape index: {}]   ;;  %s2267_s2 = inlined_call_operand.hbm [shape: bf16[32,512], index: 2, kind: input, shape index: {}]   ;;  %s2268_s3 = inlined_call_operand.vmem [shape: bf16[1,512], index: 3, kind: input, shape index: {}]   ;;  %s2269_s4 = inlined_call_operand.hbm [shape: bf16[512,384], index: 4, kind: input, shape index: {}]   ;;  %s2270_s5 = inlined_call_operand.vmem [shape: bf16[8,384], index: 5, kind: input, shape index: {}]   ;;  %s2271_s6 = inlined_call_operand.vmem [shape: bf16[1,384], index: 6, kind: input, shape index: {}]   ;;  %s2272_s7 = inlined_call_operand.hbm [shape: bf16[384,128], index: 7, kind: input, shape index: {}]   ;;  %s2273_s8 = inlined_call_operand.vmem [shape: bf16[1,128], index: 8, kind: input, shape index: {}]   ;;  %s2274_s9 = inlined_call_operand.hbm [shape: f32[2,51], index: 9, kind: output, shape index: {}]  }
   0x1   :  { %15 = vsyncpa [#allocation6], 0 }
   0x2   :  { %16 = vsyncpa [#allocation9], 0 }
   0x3   :  { %17 = vsyncpa [#allocation4], 0 }
   0x4   :  { %22 = vsyncadd [#allocation3], 96  ;;  %s2059_s30 = smov [#allocation5]   ;;  %s1941_s13 = scalar_lea.hbm %s2267_s2, 1024 }
   0x5   :  { %s37_s10 = sshll.u32 %s2059_s30, 4  ;;  %p1942_p0 = scmp.ne.s32.totalorder %s2267_s2, %s1941_s13  ;;  %s38_s10 = int_to_ptr.vmem [resolvable:$true] %s37_s10 }
   0x6   :  { %p1945_p1 = scmp.lt.u32.totalorder %s1941_s13, %s2267_s2 }
   0x8   :  { %p1947_p2 = pnand %p1945_p1, %p1942_p0 }
   0xa   :  { %1950 = shalt.err (!%p1947_p2)
}
   0xb   :  { %s1951_s18 = scalar_lea.vmem %s38_s10, 1024  ;;  %p1956_p4 = scmp.lt.s32.totalorder %s38_s10, %s38_s10 }
   0xc   :  { %p1952_p3 = scmp.ne.s32.totalorder %s38_s10, %s1951_s18  ;;  %p1957_p5 = scmp.lt.s32.totalorder %s1951_s18, %s1951_s18 }
   0xe   :  { %p1958_p6 = por %p1957_p5, %p1956_p4 }
  0x10   :  { %p1959_p7 = pnand %p1958_p6, %p1952_p3 }
  0x12   :  { %1962 = shalt.err (!%p1959_p7)
}
  0x13   :  { %s2060_s19 = smov 256   ;;  %s2061_s20 = smov 16  }
  0x14   :  { %43 = dma.hbm_to_vmem [thread:$0]  %s2267_s2, 1024, %s38_s10, [#allocation6], %s2060_s19, %s2060_s19, %s2061_s20  }
  0x15   :  { %s2062_s23 = smov [#allocation2]   ;;  %s1963_s27 = scalar_lea.hbm %s2265_s0, 32 }
  0x16   :  { %s23_s24 = sshll.u32 %s2062_s23, 4  ;;  %p1964_p8 = scmp.ne.s32.totalorder %s2265_s0, %s1963_s27  ;;  %s24_s24 = int_to_ptr.vmem [resolvable:$true] %s23_s24 }
  0x17   :  { %p1967_p9 = scmp.lt.u32.totalorder %s1963_s27, %s2265_s0 }
  0x19   :  { %p1969_p10 = pnand %p1967_p9, %p1964_p8 }
  0x1b   :  { %1972 = shalt.err (!%p1969_p10)
}
  0x1c   :  { %s1973_s12 = scalar_lea.vmem %s24_s24, 32  ;;  %s1977_s2 = scalar_lea.vmem %s24_s24, 128 }
  0x1d   :  { %p1974_p11 = scmp.ne.s32.totalorder %s24_s24, %s1973_s12  ;;  %p1978_p12 = scmp.lt.s32.totalorder %s24_s24, %s24_s24 }
  0x1e   :  { %p1979_p13 = scmp.lt.s32.totalorder %s1977_s2, %s1973_s12 }
  0x20   :  { %p1980_p0 = por %p1979_p13, %p1978_p12 }
  0x22   :  { %p1981_p1 = pnand %p1980_p0, %p1974_p11 }
  0x24   :  { %1984 = shalt.err (!%p1981_p1)
}
  0x25   :  { %s2063_s10 = smov 32   ;;  %s2064_s13 = smov 2  }
  0x26   :  { %29 = dma.hbm_to_vmem [thread:$0]  %s2265_s0, 32, %s24_s24, [#allocation3], %s2063_s10, %s2063_s10, %s2064_s13  }
  0x27   :  { %s2065_s16 = smov [#allocation7]   ;;  %s1985_s20 = scalar_lea.hbm %s2269_s4, 12288 }
  0x28   :  { %s51_s17 = sshll.u32 %s2065_s16, 4  ;;  %p1986_p2 = scmp.ne.s32.totalorder %s2269_s4, %s1985_s20  ;;  %s52_s17 = int_to_ptr.vmem [resolvable:$true] %s51_s17 }
  0x29   :  { %p1989_p3 = scmp.lt.u32.totalorder %s1985_s20, %s2269_s4 }
  0x2b   :  { %p1991_p4 = pnand %p1989_p3, %p1986_p2 }
  0x2d   :  { %1994 = shalt.err (!%p1991_p4)
}
  0x2e   :  { %s1995_s26 = scalar_lea.vmem %s52_s17, 12288  ;;  %p2000_p6 = scmp.lt.s32.totalorder %s52_s17, %s52_s17 }
  0x2f   :  { %p1996_p5 = scmp.ne.s32.totalorder %s52_s17, %s1995_s26  ;;  %p2001_p7 = scmp.lt.s32.totalorder %s1995_s26, %s1995_s26 }
  0x31   :  { %p2002_p8 = por %p2001_p7, %p2000_p6 }
  0x33   :  { %p2003_p9 = pnand %p2002_p8, %p1996_p5 }
  0x35   :  { %2006 = shalt.err (!%p2003_p9)
}
  0x36   :  { %s2066_s0 = smov 192   ;;  %s2067_s24 = smov 12  }
  0x37   :  { %57 = dma.hbm_to_vmem [thread:$0]  %s2269_s4, 12288, %s52_s17, [#allocation6], %s2066_s0, %s2066_s0, %s2067_s24  }
  0x38   :  { %s2068_s29 = smov [#allocation8]   ;;  %s2007_s2 = scalar_lea.hbm %s2272_s7, 3072 }
  0x39   :  { %s67_s30 = sshll.u32 %s2068_s29, 4  ;;  %p2008_p10 = scmp.ne.s32.totalorder %s2272_s7, %s2007_s2  ;;  %s68_s30 = int_to_ptr.vmem [resolvable:$true] %s67_s30 }
  0x3a   :  { %p2011_p11 = scmp.lt.u32.totalorder %s2007_s2, %s2272_s7 }
  0x3c   :  { %p2013_p12 = pnand %p2011_p11, %p2008_p10 }
  0x3e   :  { %2016 = shalt.err (!%p2013_p12)
}
  0x3f   :  { %s2017_s19 = scalar_lea.vmem %s68_s30, 3072  ;;  %p2022_p0 = scmp.lt.s32.totalorder %s68_s30, %s68_s30 }
  0x40   :  { %p2018_p13 = scmp.ne.s32.totalorder %s68_s30, %s2017_s19  ;;  %p2023_p1 = scmp.lt.s32.totalorder %s2017_s19, %s2017_s19 }
  0x42   :  { %p2024_p2 = por %p2023_p1, %p2022_p0 }
  0x44   :  { %p2025_p3 = pnand %p2024_p2, %p2018_p13 }
  0x46   :  { %2028 = shalt.err (!%p2025_p3)
}
  0x47   :  { %s2069_s4 = smov 64   ;;  %s2070_s17 = smov 4  }
  0x48   :  { %73 = dma.hbm_to_vmem [thread:$0]  %s2272_s7, 3072, %s68_s30, [#allocation9], %s2069_s4, %s2069_s4, %s2070_s17  }
  0x49   :  { %2051 = dma.done.wait [#allocation3], 128  }
  0x4a   :  { %2052 = vsyncadd [#allocation3], 4294967168 }
  0x4b   :  { %2053 = dma.done.wait [#allocation6], 13312  }
  0x4c   :  { %2054 = vsyncadd [#allocation6], 4294953984 }
  0x4d   :  { %2055 = dma.done.wait [#allocation9], 3072  }
  0x4e   :  { %2056 = vsyncadd [#allocation9], 4294964224  ;;  %v2071_v0 = vmov 0   ;;  %v1774_v1 = vld [vmem:[#allocation5 + $0x4] ss:$16 sps:$4 sm:$0xff]   ;;  %v89_v9 = vld [vmem:[#allocation2] sm:$0xff] }
  0x4f   :  { %214 = vmatprep.mubr.bf16.mxu0 %v2071_v0  ;;  %255 = vmatprep.mubr.bf16.mxu1 %v2071_v0  ;;  %v1776_v2 = vld [vmem:[#allocation5 + $0xc] ss:$16 sps:$4 sm:$0xff]   ;;  %v1778_v3 = vld [vmem:[#allocation5] ss:$16 sps:$4 sm:$0xff]   ;;  %v1779_v4 = vld [vmem:[#allocation5 + $0x8] ss:$16 sps:$4 sm:$0xff]   ;;  %v90_v14 = vpack.c.bf16 %v89_v9, %v89_v9 }
  0x50   :  { %182 = vmatprep.subr.bf16.mxu0 %v1774_v1  ;;  %223 = vmatprep.subr.bf16.mxu1 %v1776_v2  ;;  %v1780_v5 = vld [vmem:[#allocation5 + $0x24] ss:$16 sps:$4 sm:$0xff]   ;;  %v1782_v6 = vld [vmem:[#allocation5 + $0x2c] ss:$16 sps:$4 sm:$0xff]   ;;  %v1784_v7 = vld [vmem:[#allocation5 + $0x20] ss:$16 sps:$4 sm:$0xff]  }
  0x51   :  { %183 = vmatpush1.bf16.msra.mxu0 %v1778_v3  ;;  %224 = vmatpush1.bf16.msra.mxu1 %v1779_v4  ;;  %v1785_v8 = vld [vmem:[#allocation5 + $0x28] ss:$16 sps:$4 sm:$0xff]   ;;  %vm416_vm0 = vcmask 1043456   ;;  %v1788_v13 = vld [vmem:[%s2270_s5 + $0x8] ss:$0 sps:$4 sm:$0xff]   ;;  %vm178_vm1 = vcmask 261120  }
  0x52   :  { %184 = vmatprep.subr.bf16.mxu0 %v1780_v5  ;;  %v402_v10 = vld [vmem:[%s2270_s5] sm:$0xff]  ;;  %225 = vmatprep.subr.bf16.mxu1 %v1782_v6  ;;  %v2072_v16 = vmov 0.0   ;;  %v424_v17 = vsel %vm416_vm0, %v1788_v13, 0  ;;  %v1791_v18 = vld [vmem:[#allocation7 + $0x4] ss:$12 sps:$4 sm:$0xff]   ;;  %vm2073_vm2 = vmmov 0  }
  0x53   :  { %v1530_v11 = vcombine.high %v402_v10, %v402_v10  ;;  %v1529_v12 = vcombine.low %v402_v10, %v402_v10  ;;  %v1794_v19 = vld [vmem:[#allocation7 + $0x184] ss:$12 sps:$4 sm:$0xff]   ;;  %v400_v20 = vld [vmem:[%s2266_s1] sm:$0xff]  ;;  %v1789_v22 = vld [vmem:[#allocation7] ss:$12 sps:$4 sm:$0xff]   ;;  %vm412_vm3 = vcmask 64512  }
  0x54   :  { %v401_v21 = vpack.c.bf16 %v400_v20, %v400_v20  ;;  %v1792_v23 = vld [vmem:[#allocation7 + $0x180] ss:$12 sps:$4 sm:$0xff]   ;;  %v1797_v24 = vld [vmem:[#allocation7 + $0x1c] ss:$12 sps:$4 sm:$0xff]   ;;  %v1795_v26 = vld [vmem:[#allocation7 + $0x18] ss:$12 sps:$4 sm:$0xff]  }
  0x55   :  { %185 = vmatpush1.bf16.msra.mxu0 %v1784_v7  ;;  %226 = vmatpush1.bf16.msra.mxu1 %v1785_v8  ;;  %v418_v15 = vsel %vm416_vm0, %v1529_v12, 0  ;;  %v1800_v25 = vld [vmem:[#allocation7 + $0x19c] ss:$12 sps:$4 sm:$0xff]   ;;  %v1798_v27 = vld [vmem:[#allocation7 + $0x198] ss:$12 sps:$4 sm:$0xff]   ;;  %vm1498_vm4 = vcmask 416768  }
  0x56   :  { %1532 = vmatprep.subr.msk.bf16.mxu0 %vm416_vm0, %v1530_v11  ;;  %1732 = vmatprep.subr.bf16.mxu1 %v2072_v16  ;;  %v1803_v28 = vld [vmem:[#allocation7 + $0x34] ss:$12 sps:$4 sm:$0xff]   ;;  %v1801_v30 = vld [vmem:[#allocation7 + $0x30] ss:$12 sps:$4 sm:$0xff]   ;;  %v1809_v32 = vld [vmem:[#allocation7 + $0x4c] ss:$12 sps:$4 sm:$0xff]  }
  0x57   :  { %v1806_v29 = vld [vmem:[#allocation7 + $0x1b4] ss:$12 sps:$4 sm:$0xff]   ;;  %v1804_v31 = vld [vmem:[#allocation7 + $0x1b0] ss:$12 sps:$4 sm:$0xff]   ;;  %v1812_v33 = vld [vmem:[#allocation7 + $0x1cc] ss:$12 sps:$4 sm:$0xff]  }
  0x58   :  { %1527 = vmatmul.mubr.msk.bf16.vlgmr.msra.gmra.mrb[0].mxu0 %vm178_vm1, %v90_v14  ;;  %1528 = vmatmul.mubr.msk.bf16.vlgmr.msra.gmra.mrb[0].mxu1 %vm178_vm1, %v90_v14  ;;  %v1807_v34 = vld [vmem:[#allocation7 + $0x48] ss:$12 sps:$4 sm:$0xff]   ;;  %v1815_v36 = vld [vmem:[#allocation7 + $0x64] ss:$12 sps:$4 sm:$0xff]   ;;  %v1813_v38 = vld [vmem:[#allocation7 + $0x60] ss:$12 sps:$4 sm:$0xff]  }
  0x59   :  { %427 = vmatpush1.bf16.msra.mxu0 %v418_v15  ;;  %1733 = vmatpush3.bf16.msra.mxu1 %v424_v17  ;;  %v1810_v35 = vld [vmem:[#allocation7 + $0x1c8] ss:$12 sps:$4 sm:$0xff]   ;;  %v1818_v37 = vld [vmem:[#allocation7 + $0x1e4] ss:$12 sps:$4 sm:$0xff]   ;;  %v1816_v39 = vld [vmem:[#allocation7 + $0x1e0] ss:$12 sps:$4 sm:$0xff]  }
  0x5a   :  { %458 = vmatprep.mubr.bf16.mxu0 %v2071_v0  ;;  %1734 = vmatprep.mubr.msk.bf16.mxu1 %vm2073_vm2, %v2072_v16  ;;  %v1821_v40 = vld [vmem:[#allocation7 + $0x7c] ss:$12 sps:$4 sm:$0xff]   ;;  %v1819_v42 = vld [vmem:[#allocation7 + $0x78] ss:$12 sps:$4 sm:$0xff]   ;;  %v1827_v44 = vld [vmem:[#allocation7 + $0x94] ss:$12 sps:$4 sm:$0xff]  }
  0x5b   :  { %1019 = vmatprep.subr.bf16.mxu0 %v1791_v18  ;;  %1060 = vmatprep.subr.bf16.mxu1 %v1794_v19  ;;  %v1824_v41 = vld [vmem:[#allocation7 + $0x1fc] ss:$12 sps:$4 sm:$0xff]   ;;  %v1822_v43 = vld [vmem:[#allocation7 + $0x1f8] ss:$12 sps:$4 sm:$0xff]   ;;  %v1830_v45 = vld [vmem:[#allocation7 + $0x214] ss:$12 sps:$4 sm:$0xff]  }
  0x5c   :  { %v1825_v46 = vld [vmem:[#allocation7 + $0x90] ss:$12 sps:$4 sm:$0xff]   ;;  %v1833_v48 = vld [vmem:[#allocation7 + $0xac] ss:$12 sps:$4 sm:$0xff]   ;;  %v1831_v50 = vld [vmem:[#allocation7 + $0xa8] ss:$12 sps:$4 sm:$0xff]  }
  0x5d   :  { %v1828_v47 = vld [vmem:[#allocation7 + $0x210] ss:$12 sps:$4 sm:$0xff]   ;;  %v1836_v49 = vld [vmem:[#allocation7 + $0x22c] ss:$12 sps:$4 sm:$0xff]   ;;  %v1834_v51 = vld [vmem:[#allocation7 + $0x228] ss:$12 sps:$4 sm:$0xff]  }
  0x5e   :  { %v1839_v52 = vld [vmem:[#allocation7 + $0xc4] ss:$12 sps:$4 sm:$0xff]   ;;  %v1837_v54 = vld [vmem:[#allocation7 + $0xc0] ss:$12 sps:$4 sm:$0xff]   ;;  %v1845_v56 = vld [vmem:[#allocation7 + $0xdc] ss:$12 sps:$4 sm:$0xff]  }
  0x5f   :  { %v1842_v53 = vld [vmem:[#allocation7 + $0x244] ss:$12 sps:$4 sm:$0xff]   ;;  %v1840_v55 = vld [vmem:[#allocation7 + $0x240] ss:$12 sps:$4 sm:$0xff]   ;;  %v1848_v57 = vld [vmem:[#allocation7 + $0x25c] ss:$12 sps:$4 sm:$0xff]  }
  0x60   :  { %1533 = vmatmul.mubr.msk.bf16.vlgmr.msra.gmra.mrb[4].mxu0 %vm412_vm3, %v401_v21  ;;  %1735 = vmatmul.mubr.msk.bf16.vlgmr.msra.gmra.mrb[4].mxu1 %vm412_vm3, %v401_v21  ;;  %v1843_v58 = vld [vmem:[#allocation7 + $0xd8] ss:$12 sps:$4 sm:$0xff]   ;;  %v1851_v60 = vld [vmem:[#allocation7 + $0xf4] ss:$12 sps:$4 sm:$0xff]   ;;  %v1849_v62 = vld [vmem:[#allocation7 + $0xf0] ss:$12 sps:$4 sm:$0xff]  }
  0x61   :  { %1020 = vmatpush1.bf16.msra.mxu0 %v1789_v22  ;;  %1061 = vmatpush1.bf16.msra.mxu1 %v1792_v23  ;;  %v1846_v59 = vld [vmem:[#allocation7 + $0x258] ss:$12 sps:$4 sm:$0xff]   ;;  %v1854_v61 = vld [vmem:[#allocation7 + $0x274] ss:$12 sps:$4 sm:$0xff]   ;;  %v1852_v63 = vld [vmem:[#allocation7 + $0x270] ss:$12 sps:$4 sm:$0xff]   ;;  %v102_v23 = vlaneseq }
  0x62   :  { %1021 = vmatprep.subr.bf16.mxu0 %v1797_v24  ;;  %1062 = vmatprep.subr.bf16.mxu1 %v1800_v25  ;;  %v1857_v0 = vld [vmem:[#allocation7 + $0x10c] ss:$12 sps:$4 sm:$0xff]   ;;  %v1855_v2 = vld [vmem:[#allocation7 + $0x108] ss:$12 sps:$4 sm:$0xff]   ;;  %v1863_v4 = vld [vmem:[#allocation7 + $0x124] ss:$12 sps:$4 sm:$0xff]  }
  0x63   :  { %v1860_v1 = vld [vmem:[#allocation7 + $0x28c] ss:$12 sps:$4 sm:$0xff]   ;;  %v1858_v3 = vld [vmem:[#allocation7 + $0x288] ss:$12 sps:$4 sm:$0xff]   ;;  %v1866_v5 = vld [vmem:[#allocation7 + $0x2a4] ss:$12 sps:$4 sm:$0xff]  }
  0x64   :  { %v1861_v6 = vld [vmem:[#allocation7 + $0x120] ss:$12 sps:$4 sm:$0xff]   ;;  %v1869_v8 = vld [vmem:[#allocation7 + $0x13c] ss:$12 sps:$4 sm:$0xff]   ;;  %v1867_v10 = vld [vmem:[#allocation7 + $0x138] ss:$12 sps:$4 sm:$0xff]  }
  0x65   :  { %1022 = vmatpush1.bf16.msra.mxu0 %v1795_v26  ;;  %1063 = vmatpush1.bf16.msra.mxu1 %v1798_v27  ;;  %v1864_v7 = vld [vmem:[#allocation7 + $0x2a0] ss:$12 sps:$4 sm:$0xff]   ;;  %v1872_v9 = vld [vmem:[#allocation7 + $0x2bc] ss:$12 sps:$4 sm:$0xff]   ;;  %v1870_v11 = vld [vmem:[#allocation7 + $0x2b8] ss:$12 sps:$4 sm:$0xff]  }
  0x66   :  { %1023 = vmatprep.subr.bf16.mxu0 %v1803_v28  ;;  %1064 = vmatprep.subr.bf16.mxu1 %v1806_v29  ;;  %v1875_v12 = vld [vmem:[#allocation7 + $0x154] ss:$12 sps:$4 sm:$0xff]   ;;  %v1873_v14 = vld [vmem:[#allocation7 + $0x150] ss:$12 sps:$4 sm:$0xff]   ;;  %v1881_v17 = vld [vmem:[#allocation7 + $0x16c] ss:$12 sps:$4 sm:$0xff]  }
  0x67   :  { %v1878_v13 = vld [vmem:[#allocation7 + $0x2d4] ss:$12 sps:$4 sm:$0xff]   ;;  %v1876_v15 = vld [vmem:[#allocation7 + $0x2d0] ss:$12 sps:$4 sm:$0xff]   ;;  %v1884_v18 = vld [vmem:[#allocation7 + $0x2ec] ss:$12 sps:$4 sm:$0xff]  }
  0x68   :  { %v1879_v19 = vld [vmem:[#allocation7 + $0x168] ss:$12 sps:$4 sm:$0xff]   ;;  %v2188_v24 = vshrl.u32 %v102_v23, 7  ;;  %v99_v25 = vld [vmem:[%s2268_s3] sm:$0xf] }
  0x69   :  { %1024 = vmatpush1.bf16.msra.mxu0 %v1801_v30  ;;  %1065 = vmatpush1.bf16.msra.mxu1 %v1804_v31  ;;  %v1882_v20 = vld [vmem:[#allocation7 + $0x2e8] ss:$12 sps:$4 sm:$0xff]   ;;  %v100_v26 = vunpack.c.l.bf16 %v99_v25  ;;  %v1906_v23 = vld [vmem:[#allocation7 + $0x2c0] ss:$12 sps:$4 sm:$0xff]  }
  0x6a   :  { %1025 = vmatprep.subr.bf16.mxu0 %v1809_v32  ;;  %1066 = vmatprep.subr.bf16.mxu1 %v1812_v33  ;;  %v1885_v21 = vld [vmem:[#allocation7 + $0xc8] ss:$12 sps:$4 sm:$0xff]   ;;  %v2194_v27 = vsub.s32 0, %v2188_v24  ;;  %v112_v28 = vsub.s32 4, %v2188_v24  ;;  %v108_v29 = vsub.s32 2, %v2188_v24  ;;  %v116_v30 = vsub.s32 6, %v2188_v24 }
  0x6b   :  { %v1886_v22 = vld [vmem:[#allocation7 + $0x248] ss:$12 sps:$4 sm:$0xff]   ;;  %v1907_v25 = vld [vmem:[#allocation7 + $0x80] ss:$12 sps:$4 sm:$0xff]  }
  0x6c   :  { %v105_v31 = vrot.slane %v100_v26, %v2194_v27  ;;  %v113_v32 = vrot.slane %v100_v26, %v112_v28  ;;  %v109_v33 = vrot.slane %v100_v26, %v108_v29 }
  0x6d   :  { %1026 = vmatpush1.bf16.msra.mxu0 %v1807_v34  ;;  %1067 = vmatpush1.bf16.msra.mxu1 %v1810_v35  ;;  %v117_v34 = vrot.slane %v100_v26, %v116_v30  ;;  %v1908_v26 = vld [vmem:[#allocation7 + $0x200] ss:$12 sps:$4 sm:$0xff]   ;;  %v1909_v30 = vld [vmem:[#allocation7 + $0x158] ss:$12 sps:$4 sm:$0xff]  }
  0x6e   :  { %1027 = vmatprep.subr.bf16.mxu0 %v1815_v36  ;;  %1068 = vmatprep.subr.bf16.mxu1 %v1818_v37  ;;  %v125_v35 = vrot.slane %v105_v31, %v2194_v27  ;;  %v133_v36 = vrot.slane %v113_v32, %v2194_v27  ;;  %v129_v37 = vrot.slane %v109_v33, %v2194_v27  ;;  %v1910_v31 = vld [vmem:[#allocation7 + $0x2d8] ss:$12 sps:$4 sm:$0xff]  }
  0x6f   :  { %v1911_v32 = vld [vmem:[#allocation7 + $0x98] ss:$12 sps:$4 sm:$0xff]  }
  0x70   :  { %v1912_v33 = vld [vmem:[#allocation7 + $0x218] ss:$12 sps:$4 sm:$0xff]  }
  0x71   :  { %1028 = vmatpush1.bf16.msra.mxu0 %v1813_v38  ;;  %1069 = vmatpush1.bf16.msra.mxu1 %v1816_v39  ;;  %v137_v38 = vrot.slane %v117_v34, %v2194_v27  ;;  %v1913_v34 = vld [vmem:[#allocation7 + $0x170] ss:$12 sps:$4 sm:$0xff]  }
  0x72   :  { %1029 = vmatprep.subr.bf16.mxu0 %v1821_v40  ;;  %1070 = vmatprep.subr.bf16.mxu1 %v1824_v41 }
  0x75   :  { %1030 = vmatpush1.bf16.msra.mxu0 %v1819_v42  ;;  %1071 = vmatpush1.bf16.msra.mxu1 %v1822_v43 }
  0x76   :  { %1031 = vmatprep.subr.bf16.mxu0 %v1827_v44  ;;  %1072 = vmatprep.subr.bf16.mxu1 %v1830_v45 }
  0x79   :  { %1032 = vmatpush1.bf16.msra.mxu0 %v1825_v46  ;;  %1073 = vmatpush1.bf16.msra.mxu1 %v1828_v47 }
  0x7a   :  { %1033 = vmatprep.subr.bf16.mxu0 %v1833_v48  ;;  %1074 = vmatprep.subr.bf16.mxu1 %v1836_v49 }
  0x7d   :  { %1034 = vmatpush1.bf16.msra.mxu0 %v1831_v50  ;;  %1075 = vmatpush1.bf16.msra.mxu1 %v1834_v51 }
  0x7e   :  { %1035 = vmatprep.subr.bf16.mxu0 %v1839_v52  ;;  %1076 = vmatprep.subr.bf16.mxu1 %v1842_v53 }
  0x81   :  { %1036 = vmatpush1.bf16.msra.mxu0 %v1837_v54  ;;  %1077 = vmatpush1.bf16.msra.mxu1 %v1840_v55 }
  0x82   :  { %1037 = vmatprep.subr.bf16.mxu0 %v1845_v56  ;;  %1078 = vmatprep.subr.bf16.mxu1 %v1848_v57 }
  0x85   :  { %1038 = vmatpush1.bf16.msra.mxu0 %v1843_v58  ;;  %1079 = vmatpush1.bf16.msra.mxu1 %v1846_v59  ;;  %v1887_v58 = vld [vmem:[#allocation7 + $0x8] ss:$12 sps:$4 sm:$0xff]  }
  0x86   :  { %1039 = vmatprep.subr.bf16.mxu0 %v1851_v60  ;;  %1080 = vmatprep.subr.bf16.mxu1 %v1854_v61  ;;  %v1888_v59 = vld [vmem:[#allocation7 + $0x188] ss:$12 sps:$4 sm:$0xff]   ;;  %v1889_v61 = vld [vmem:[#allocation7 + $0xe0] ss:$12 sps:$4 sm:$0xff]  }
  0x89   :  { %1040 = vmatpush1.bf16.msra.mxu0 %v1849_v62  ;;  %1081 = vmatpush1.bf16.msra.mxu1 %v1852_v63  ;;  %v1890_v62 = vld [vmem:[#allocation7 + $0x260] ss:$12 sps:$4 sm:$0xff]  }
  0x8a   :  { %1041 = vmatprep.subr.bf16.mxu0 %v1857_v0  ;;  %1082 = vmatprep.subr.bf16.mxu1 %v1860_v1 }
  0x8d   :  { %1042 = vmatpush1.bf16.msra.mxu0 %v1855_v2  ;;  %1083 = vmatpush1.bf16.msra.mxu1 %v1858_v3  ;;  %v1891_v3 = vld [vmem:[#allocation7 + $0x20] ss:$12 sps:$4 sm:$0xff]  }
  0x8e   :  { %1043 = vmatprep.subr.bf16.mxu0 %v1863_v4  ;;  %1084 = vmatprep.subr.bf16.mxu1 %v1866_v5  ;;  %v1892_v4 = vld [vmem:[#allocation7 + $0x1a0] ss:$12 sps:$4 sm:$0xff]  }
  0x91   :  { %1044 = vmatpush1.bf16.msra.mxu0 %v1861_v6  ;;  %1085 = vmatpush1.bf16.msra.mxu1 %v1864_v7  ;;  %v1893_v7 = vld [vmem:[#allocation7 + $0xf8] ss:$12 sps:$4 sm:$0xff]  }
  0x92   :  { %1045 = vmatprep.subr.bf16.mxu0 %v1869_v8  ;;  %1086 = vmatprep.subr.bf16.mxu1 %v1872_v9  ;;  %v1894_v8 = vld [vmem:[#allocation7 + $0x278] ss:$12 sps:$4 sm:$0xff]  }
  0x95   :  { %1046 = vmatpush1.bf16.msra.mxu0 %v1867_v10  ;;  %1087 = vmatpush1.bf16.msra.mxu1 %v1870_v11  ;;  %v1895_v11 = vld [vmem:[#allocation7 + $0x38] ss:$12 sps:$4 sm:$0xff]  }
  0x96   :  { %1047 = vmatprep.subr.bf16.mxu0 %v1875_v12  ;;  %1088 = vmatprep.subr.bf16.mxu1 %v1878_v13  ;;  %v1896_v12 = vld [vmem:[#allocation7 + $0x1b8] ss:$12 sps:$4 sm:$0xff]   ;;  %v1897_v13 = vld [vmem:[#allocation7 + $0x110] ss:$12 sps:$4 sm:$0xff]  }
  0x99   :  { %1048 = vmatpush1.bf16.msra.mxu0 %v1873_v14  ;;  %1089 = vmatpush1.bf16.msra.mxu1 %v1876_v15  ;;  %v1898_v14 = vld [vmem:[#allocation7 + $0x290] ss:$12 sps:$4 sm:$0xff]  }
  0x9a   :  { %1049 = vmatprep.subr.bf16.mxu0 %v1881_v17  ;;  %1090 = vmatprep.subr.bf16.mxu1 %v1884_v18  ;;  %v1899_v15 = vld [vmem:[#allocation7 + $0x50] ss:$12 sps:$4 sm:$0xff]   ;;  %v1901_v18 = vld [vmem:[#allocation7 + $0x128] ss:$12 sps:$4 sm:$0xff]  }
  0x9b   :  { %v1900_v17 = vld [vmem:[#allocation7 + $0x1d0] ss:$12 sps:$4 sm:$0xff]  }
  0x9d   :  { %1050 = vmatpush1.bf16.msra.mxu0 %v1879_v19  ;;  %1091 = vmatpush1.bf16.msra.mxu1 %v1882_v20  ;;  %v1902_v19 = vld [vmem:[#allocation7 + $0x2a8] ss:$12 sps:$4 sm:$0xff]  }
  0x9e   :  { %1657 = vmatprep.subr.bf16.mxu0 %v1885_v21  ;;  %1679 = vmatprep.subr.bf16.mxu1 %v1886_v22  ;;  %v1903_v20 = vld [vmem:[#allocation7 + $0x68] ss:$12 sps:$4 sm:$0xff]   ;;  %v1905_v22 = vld [vmem:[#allocation7 + $0x140] ss:$12 sps:$4 sm:$0xff]  }
  0x9f   :  { %v1904_v21 = vld [vmem:[#allocation7 + $0x1e8] ss:$12 sps:$4 sm:$0xff]  }
 0x12b   :  { %v216_v39 = vpop.f32.mrb[0].mxu0  ;;  %v257_v40 = vpop.f32.mrb[0].mxu1 }
 0x12c   :  { %v217_v41 = vadd.f32 %v216_v39, %v125_v35  ;;  %v258_v42 = vadd.f32 %v257_v40, %v133_v36  ;;  %v218_v43 = vpop.f32.mrb[1].mxu0  ;;  %v259_v44 = vpop.f32.mrb[1].mxu1  ;;  %v1914_v35 = vld [vmem:[#allocation7 + $0x2f0] ss:$12 sps:$4 sm:$0xff]   ;;  %v1918_v39 = vld [vmem:[#allocation8] sm:$0xff]   ;;  %v1919_v40 = vld [vmem:[#allocation8 + $0x48] sm:$0xff]  }
 0x12d   :  { %v219_v45 = vadd.f32 %v218_v43, %v129_v37  ;;  %v260_v46 = vadd.f32 %v259_v44, %v137_v38  ;;  %v220_v47 = vpop.f32.mrb[2].mxu0  ;;  %v261_v48 = vpop.f32.mrb[2].mxu1  ;;  %v1915_v36 = vld [vmem:[#allocation7 + $0xb0] ss:$12 sps:$4 sm:$0xff]   ;;  %v1917_v38 = vld [vmem:[#allocation8 + $0x40] sm:$0xff]  }
 0x12e   :  { %v264_v49 = vmax.f32 %v217_v41, 0.0  ;;  %v266_v50 = vmax.f32 %v258_v42, 0.0  ;;  %v221_v51 = vpop.f32.mrb[3].mxu0  ;;  %v262_v52 = vpop.f32.mrb[3].mxu1  ;;  %v1916_v37 = vld [vmem:[#allocation7 + $0x230] ss:$12 sps:$4 sm:$0xff]  }
 0x12f   :  { %v265_v53 = vmax.f32 %v219_v45, 0.0  ;;  %v267_v54 = vmax.f32 %v260_v46, 0.0  ;;  %v1920_v41 = vld [vmem:[#allocation8 + $0x8] sm:$0xff]   ;;  %v1921_v42 = vld [vmem:[#allocation8 + $0x50] sm:$0xff]   ;;  %v1923_v44 = vld [vmem:[#allocation8 + $0x58] sm:$0xff]  }
 0x130   :  { %v2208_v55 = vpack.c.bf16 %v266_v50, %v266_v50  ;;  %v2210_v60 = vpack.c.bf16 %v264_v49, %v264_v49  ;;  %v1922_v43 = vld [vmem:[#allocation8 + $0x10] sm:$0xff]   ;;  %v1924_v45 = vld [vmem:[#allocation8 + $0x18] sm:$0xff]   ;;  %v1925_v46 = vld [vmem:[#allocation8 + $0x60] sm:$0xff]  }
 0x131   :  { %v269_v56 = vpack.c.bf16 %v265_v53, %v265_v53  ;;  %v271_v57 = vpack.c.bf16 %v267_v54, %v267_v54  ;;  %v1926_v47 = vld [vmem:[#allocation8 + $0x20] sm:$0xff]   ;;  %v1927_v48 = vld [vmem:[#allocation8 + $0x68] sm:$0xff]   ;;  %v1929_v50 = vld [vmem:[#allocation8 + $0x70] sm:$0xff]  }
 0x132   :  { %v1928_v49 = vld [vmem:[#allocation8 + $0x28] sm:$0xff]   ;;  %v1930_v51 = vld [vmem:[#allocation8 + $0x30] sm:$0xff]   ;;  %v1931_v52 = vld [vmem:[#allocation8 + $0x78] sm:$0xff]  }
 0x133   :  { %1051 = vmatprep.mubr.bf16.mxu0 %v269_v56  ;;  %1092 = vmatprep.mubr.bf16.mxu1 %v271_v57  ;;  %v2212_v63 = vpop.f32.mrb[4].mxu0  ;;  %v2214_v0 = vpop.f32.mrb[4].mxu1  ;;  %v1932_v53 = vld [vmem:[#allocation8 + $0x38] sm:$0xff]   ;;  %v1933_v54 = vld [vmem:[#allocation8 + $0x80] sm:$0xff]  }
 0x134   :  { %1052 = vmatmul.mubr.bf16.vlgmr.msra.gmra.mrb[8].mxu0 %v2210_v60  ;;  %1093 = vmatmul.mubr.bf16.vlgmr.msra.gmra.mrb[8].mxu1 %v2208_v55  ;;  %v2218_v1 = vpop.f32.mrb[5].mxu0  ;;  %v1736_v2 = vpop.f32.mrb[5].mxu1 }
 0x135   :  { %1658 = vmatpush3.bf16.msra.mxu0 %v1887_v58  ;;  %1680 = vmatpush3.bf16.msra.mxu1 %v1888_v59  ;;  %v464_v5 = vpop.f32.mrb[6].mxu0  ;;  %v504_v6 = vpop.f32.mrb[6].mxu1  ;;  %v1937_v58 = vld [vmem:[#allocation8 + $0xa0] sm:$0xff]   ;;  %v1938_v59 = vld [vmem:[#allocation8 + $0xa8] sm:$0xff]  }
 0x136   :  { %1133 = vmatprep.mubr.bf16.mxu0 %v269_v56  ;;  %1173 = vmatprep.mubr.bf16.mxu1 %v271_v57  ;;  %v465_v9 = vpop.f32.mrb[7].mxu0  ;;  %v1737_v10 = vpop.f32.mrb[7].mxu1  ;;  %v1935_v56 = vld [vmem:[#allocation8 + $0x90] sm:$0xff]   ;;  %v1936_v57 = vld [vmem:[#allocation8 + $0x98] sm:$0xff]  }
 0x137   :  { %1659 = vmatprep.subr.bf16.mxu0 %v1889_v61  ;;  %1681 = vmatprep.subr.bf16.mxu1 %v1890_v62  ;;  %v1940_v61 = vld [vmem:[#allocation8 + $0xb8] sm:$0xff]  }
 0x138   :  { %v1181_v62 = vld [vmem:[%s2271_s6] sm:$0x7] }
 0x139   :  { %1660 = vmatpush3.bf16.msra.mxu0 %v1891_v3  ;;  %1682 = vmatpush3.bf16.msra.mxu1 %v1892_v4  ;;  %v1182_v2 = vunpack.c.l.bf16 %v1181_v62 }
 0x13a   :  { %1661 = vmatprep.subr.bf16.mxu0 %v1893_v7  ;;  %1683 = vmatprep.subr.bf16.mxu1 %v1894_v8 }
 0x13b   :  { %v1187_v3 = vrot.slane %v1182_v2, %v2194_v27  ;;  %v1191_v4 = vrot.slane %v1182_v2, %v108_v29 }
 0x13d   :  { %1662 = vmatpush3.bf16.msra.mxu0 %v1895_v11  ;;  %1684 = vmatpush3.bf16.msra.mxu1 %v1896_v12  ;;  %v1202_v8 = vrot.slane %v1187_v3, %v2194_v27  ;;  %v1206_v11 = vrot.slane %v1191_v4, %v2194_v27 }
 0x13e   :  { %1663 = vmatprep.subr.bf16.mxu0 %v1897_v13  ;;  %1685 = vmatprep.subr.bf16.mxu1 %v1898_v14 }
 0x141   :  { %1664 = vmatpush3.bf16.msra.mxu0 %v1899_v15  ;;  %1686 = vmatpush3.bf16.msra.mxu1 %v1900_v17 }
 0x142   :  { %1665 = vmatprep.subr.bf16.mxu0 %v1901_v18  ;;  %1687 = vmatprep.subr.bf16.mxu1 %v1902_v19 }
 0x145   :  { %1666 = vmatpush3.bf16.msra.mxu0 %v1903_v20  ;;  %1688 = vmatpush3.bf16.msra.mxu1 %v1904_v21 }
 0x146   :  { %1667 = vmatprep.subr.bf16.mxu0 %v1905_v22  ;;  %1689 = vmatprep.subr.bf16.mxu1 %v1906_v23 }
 0x149   :  { %1668 = vmatpush3.bf16.msra.mxu0 %v1907_v25  ;;  %1690 = vmatpush3.bf16.msra.mxu1 %v1908_v26 }
 0x14a   :  { %1669 = vmatprep.subr.bf16.mxu0 %v1909_v30  ;;  %1691 = vmatprep.subr.bf16.mxu1 %v1910_v31 }
 0x14d   :  { %1670 = vmatpush3.bf16.msra.mxu0 %v1911_v32  ;;  %1692 = vmatpush3.bf16.msra.mxu1 %v1912_v33 }
 0x14e   :  { %1671 = vmatprep.subr.bf16.mxu0 %v1913_v34  ;;  %1693 = vmatprep.subr.bf16.mxu1 %v1914_v35 }
 0x151   :  { %1672 = vmatpush3.bf16.msra.mxu0 %v1915_v36  ;;  %1694 = vmatpush3.bf16.msra.mxu1 %v1916_v37 }
 0x152   :  { %1701 = vmatprep.subr.bf16.mxu0 %v1917_v38  ;;  %1738 = vmatprep.subr.bf16.mxu1 %v2072_v16 }
 0x154   :  { %1134 = vmatmul.mubr.bf16.vlgmr.msra.gmra.mrb[12].mxu0 %v2210_v60  ;;  %1174 = vmatmul.mubr.bf16.vlgmr.msra.gmra.mrb[12].mxu1 %v2208_v55  ;;  %v1934_v55 = vld [vmem:[#allocation8 + $0x88] sm:$0xff]   ;;  %v1939_v60 = vld [vmem:[#allocation8 + $0xb0] sm:$0xff]  }
 0x155   :  { %1702 = vmatpush3.bf16.msra.mxu0 %v1918_v39  ;;  %1754 = vmatprep.mubr.msk.bf16.mxu1 %vm2073_vm2, %v2072_v16 }
 0x156   :  { %1703 = vmatprep.subr.bf16.mxu0 %v1919_v40  ;;  %1739 = vmatpush3.bf16.msra.mxu1 %v1933_v54 }
 0x157   :  { %1740 = vmatprep.subr.bf16.mxu1 %v2072_v16 }
 0x159   :  { %1704 = vmatpush3.bf16.msra.mxu0 %v1920_v41 }
 0x15a   :  { %1705 = vmatprep.subr.bf16.mxu0 %v1921_v42  ;;  %1741 = vmatpush3.bf16.msra.mxu1 %v1934_v55 }
 0x15b   :  { %1742 = vmatprep.subr.bf16.mxu1 %v2072_v16 }
 0x15d   :  { %1706 = vmatpush3.bf16.msra.mxu0 %v1922_v43 }
 0x15e   :  { %1707 = vmatprep.subr.bf16.mxu0 %v1923_v44  ;;  %1743 = vmatpush3.bf16.msra.mxu1 %v1935_v56 }
 0x15f   :  { %1744 = vmatprep.subr.bf16.mxu1 %v2072_v16 }
 0x161   :  { %1708 = vmatpush3.bf16.msra.mxu0 %v1924_v45 }
 0x162   :  { %1709 = vmatprep.subr.bf16.mxu0 %v1925_v46  ;;  %1745 = vmatpush3.bf16.msra.mxu1 %v1936_v57  ;;  %v1268_v46 = vld [vmem:[%s2273_s8] sm:$0x1] }
 0x163   :  { %1746 = vmatprep.subr.bf16.mxu1 %v2072_v16 }
 0x165   :  { %1710 = vmatpush3.bf16.msra.mxu0 %v1926_v47  ;;  %v1269_v47 = vunpack.c.l.bf16 %v1268_v46 }
 0x166   :  { %1711 = vmatprep.subr.bf16.mxu0 %v1927_v48  ;;  %1747 = vmatpush3.bf16.msra.mxu1 %v1937_v58 }
 0x167   :  { %1748 = vmatprep.subr.bf16.mxu1 %v2072_v16  ;;  %v1273_v48 = vrot.slane %v1269_v47, %v2194_v27 }
 0x169   :  { %1712 = vmatpush3.bf16.msra.mxu0 %v1928_v49 }
 0x16a   :  { %1713 = vmatprep.subr.bf16.mxu0 %v1929_v50  ;;  %1749 = vmatpush3.bf16.msra.mxu1 %v1938_v59 }
 0x16b   :  { %1750 = vmatprep.subr.bf16.mxu1 %v2072_v16 }
 0x16d   :  { %1714 = vmatpush3.bf16.msra.mxu0 %v1930_v51 }
 0x16e   :  { %1715 = vmatprep.subr.bf16.mxu0 %v1931_v52  ;;  %1751 = vmatpush3.bf16.msra.mxu1 %v1939_v60 }
 0x16f   :  { %1752 = vmatprep.subr.bf16.mxu1 %v2072_v16 }
 0x171   :  { %1716 = vmatpush3.bf16.msra.mxu0 %v1932_v53 }
 0x172   :  { %1753 = vmatpush3.bf16.msra.mxu1 %v1940_v61 }
 0x207   :  { %v1053_v5 = vpop.f32.mrb[8].mxu0  ;;  %v1094_v6 = vpop.f32.mrb[8].mxu1 }
 0x208   :  { %v1054_v7 = vadd.f32 %v1053_v5, %v2212_v63  ;;  %v1055_v9 = vpop.f32.mrb[9].mxu0  ;;  %v1096_v16 = vpop.f32.mrb[9].mxu1 }
 0x209   :  { %v1056_v10 = vadd.f32 %v1055_v9, %v2218_v1  ;;  %v1057_v12 = vpop.f32.mrb[10].mxu0  ;;  %v1098_v13 = vpop.f32.mrb[10].mxu1  ;;  %v1195_v1 = vrot.slane %v1182_v2, %v112_v28 }
 0x20a   :  { %v1095_v14 = vadd.f32 %v1094_v6, %v1054_v7  ;;  %v1058_v15 = vpop.f32.mrb[11].mxu0  ;;  %v1099_v17 = vpop.f32.mrb[11].mxu1 }
 0x20b   :  { %v1097_v18 = vadd.f32 %v1096_v16, %v1056_v10  ;;  %v1210_v38 = vrot.slane %v1195_v1, %v2194_v27 }
 0x20c   :  { %v1211_v19 = vadd.f32 %v1202_v8, %v1095_v14 }
 0x20d   :  { %v1212_v29 = vadd.f32 %v1206_v11, %v1097_v18 }
 0x20e   :  { %v1214_v20 = vmax.f32 %v1211_v19, 0.0 }
 0x20f   :  { %v1215_v21 = vmax.f32 %v1212_v29, 0.0 }
 0x210   :  { %v1217_v63 = vpack.c.bf16 %v1214_v20, %v1214_v20 }
 0x211   :  { %v1218_v22 = vpack.c.bf16 %v1215_v21, %v1215_v21 }
 0x213   :  { %1450 = vmatprep.mubr.bf16.mxu0 %v1218_v22 }
 0x214   :  { %1451 = vmatmul.mubr.bf16.vlgmr.msra.gmra.mrb[16].mxu0 %v1217_v63 }
 0x227   :  { %v1673_v23 = vpop.f32.mrb[12].mxu0  ;;  %v1695_v25 = vpop.f32.mrb[12].mxu1 }
 0x228   :  { %v1674_v26 = vpop.f32.mrb[13].mxu0  ;;  %v1696_v30 = vpop.f32.mrb[13].mxu1 }
 0x229   :  { %v1675_v31 = vadd.f32 %v1674_v26, %v1673_v23  ;;  %v1697_v32 = vadd.f32 %v1696_v30, %v1695_v25  ;;  %v1676_v33 = vpop.f32.mrb[14].mxu0  ;;  %v1698_v34 = vpop.f32.mrb[14].mxu1 }
 0x22a   :  { %v1677_v35 = vpop.f32.mrb[15].mxu0  ;;  %v1699_v36 = vpop.f32.mrb[15].mxu1 }
 0x22b   :  { %v1136_v37 = vadd.f32 %v1675_v31, %v2214_v0 }
 0x22d   :  { %v1176_v39 = vadd.f32 %v1697_v32, %v1136_v37 }
 0x22f   :  { %v1213_v40 = vadd.f32 %v1210_v38, %v1176_v39 }
 0x231   :  { %v1216_v41 = vmax.f32 %v1213_v40, 0.0 }
 0x233   :  { %v1219_v42 = vpack.c.bf16 %v1216_v41, %v1216_v41 }
 0x235   :  { %1755 = vmatmul.mubr.bf16.vlgmr.msra.gmra.mrb[16].mxu1 %v1219_v42 }
 0x2e7   :  { %v1717_v43 = vpop.f32.mrb[16].mxu0 }
 0x2e8   :  { %v1718_v24 = vpop.f32.mrb[17].mxu0 }
 0x2e9   :  { %v1719_v28 = vadd.f32 %v1718_v24, %v1717_v43  ;;  %v1720_v44 = vpop.f32.mrb[18].mxu0 }
 0x2ea   :  { %v1721_v45 = vpop.f32.mrb[19].mxu0 }
 0x2eb   :  { %v1453_v0 = vadd.f32 %v1719_v28, %v1273_v48 }
 0x308   :  { %v1492_v49 = vpop.f32.mrb[16].mxu1 }
 0x309   :  { %v1493_v50 = vadd.f32 %v1492_v49, %v1453_v0  ;;  %v1756_v51 = vpop.f32.mrb[17].mxu1 }
 0x30a   :  { %v1495_v52 = vpop.f32.mrb[18].mxu1 }
 0x30b   :  { %1499 = vst.msk [vmem:[#allocation10] sm:$0xff] %vm1498_vm4, %v1493_v50  ;;  %v1757_v53 = vpop.f32.mrb[19].mxu1 }
 0x30c   :  { %1504 = vsyncadd [#allocation4], 96  ;;  %s2074_s28 = smov [#allocation10]  }
 0x30d   :  { %s1505_s29 = sshll.u32 %s2074_s28, 4  ;;  %s1506_s29 = int_to_ptr.vmem [resolvable:$true] %s1505_s29 }
 0x30e   :  { %s2029_s30 = scalar_lea.vmem %s1506_s29, 32  ;;  %s2033_s11 = scalar_lea.vmem %s1506_s29, 128 }
 0x30f   :  { %p2030_p4 = scmp.ne.s32.totalorder %s1506_s29, %s2029_s30  ;;  %p2034_p5 = scmp.lt.s32.totalorder %s1506_s29, %s1506_s29 }
 0x310   :  { %p2035_p6 = scmp.lt.s32.totalorder %s2033_s11, %s2029_s30 }
 0x312   :  { %p2036_p7 = por %p2035_p6, %p2034_p5 }
 0x314   :  { %p2037_p8 = pnand %p2036_p7, %p2030_p4 }
 0x316   :  { %2040 = shalt.err (!%p2037_p8)
}
 0x317   :  { %s2041_s2 = scalar_lea.hbm %s2274_s9, 32 }
 0x318   :  { %p2042_p9 = scmp.ne.s32.totalorder %s2274_s9, %s2041_s2  ;;  %p2045_p10 = scmp.lt.u32.totalorder %s2041_s2, %s2274_s9 }
 0x31a   :  { %p2047_p11 = pnand %p2045_p10, %p2042_p9 }
 0x31c   :  { %2050 = shalt.err (!%p2047_p11)
}
 0x31d   :  { %1511 = dma.vmem_to_hbm [thread:$0]  %s1506_s29, 32, %s2274_s9, [#allocation4], %s2063_s10, %s2063_s10, %s2064_s13  }
 0x31e   :  { %2057 = dma.done.wait [#allocation4], 128  }
 0x31f   :  { %2058 = vsyncadd [#allocation4], 4294967168 }
 0x320   :  { %1515 = vsyncpa [#allocation3], 1 }
 0x321   :  { %1516 = vsyncpa [#allocation6], 1 }
 0x322   :  { %1517 = vsyncpa [#allocation9], 1 }
 0x323   :  { %1518 = vsyncpa [#allocation4], 1 }

</bundles_post_ra>
